<compile_context>
chip_gen: v7x
topology: tpu7x:2x2x1
jax: 0.10.0
libtpu: 0.0.40
codegen_flags: <defaults>
</compile_context>

<pallas_src>
import jax
import jax.numpy as jnp
import numpy as np
from jax.experimental import pallas as pl
from jax.experimental.pallas import tpu as pltpu


# ----------------------------------------------------------------------------- kernel
def nri_conv_kernel(xf_ref, rrec_ref, rsend_ref, rrec_t_ref, rt0_ref, rt1_ref,
                    w1s_ref, w1r_ref, b1_ref, w2_ref, b2_ref,
                    wo1x_ref, wo1m_ref, bo1_ref, wo2_ref, bo2_ref, out_ref):
    f32 = jnp.float32
    xf = xf_ref[...]                                                       # [BN, C]

    # edge gathers: receivers / senders = rel_rec @ x, rel_send @ x (block-diag over batch)
    senders = jnp.dot(rsend_ref[...], xf, preferred_element_type=f32)      # [BE, C]
    receivers = jnp.dot(rrec_ref[...], xf, preferred_element_type=f32)     # [BE, C]

    # msg_fc1 for BOTH edge types fused on the lane axis; the concat
    # cat([senders, receivers]) is replaced by split-weight matmul sum.
    m = (jnp.dot(senders, w1s_ref[...], preferred_element_type=f32)
         + jnp.dot(receivers, w1r_ref[...], preferred_element_type=f32)
         + b1_ref[...])                                                    # [BE, 2C]
    m = jnp.maximum(m, 0.0)                                                # relu
    # TODO(synk): dropout is identity here (p=0.0 / eval); training-mode dropout
    # would use pltpu.prng_seed + pltpu.prng_random_bits.

    # msg_fc2 for both edge types as one block-diagonal matmul.
    m = jnp.dot(m, w2_ref[...], preferred_element_type=f32) + b2_ref[...]  # [BE, 2C]
    m = jnp.maximum(m, 0.0)

    # weighted sum over edge types: msg_i * rel_type[..., i]
    cout = out_ref.shape[1]
    all_msgs = rt0_ref[...] * m[:, :cout] + rt1_ref[...] * m[:, cout:]     # [BE, C]

    # aggregation back to nodes: rel_rec^T @ all_msgs (block-diag over batch)
    agg = jnp.dot(rrec_t_ref[...], all_msgs, preferred_element_type=f32)   # [BN, C]

    # out_fc1 on cat([inputs, agg_msgs]) -> split-weight matmul sum (no concat)
    p = (jnp.dot(xf, wo1x_ref[...], preferred_element_type=f32)
         + jnp.dot(agg, wo1m_ref[...], preferred_element_type=f32)
         + bo1_ref[...])
    p = jnp.maximum(p, 0.0)
    p = jnp.dot(p, wo2_ref[...], preferred_element_type=f32) + bo2_ref[...]
    p = jnp.maximum(p, 0.0)

    out_ref[...] = xf + p                                                  # residual


# ----------------------------------------------------------------------------- wrapper
def nri_conv_forward(inputs, rel_rec, rel_send, rel_type, params, skip_first=False):
    """Pallas-backed NRIConv.forward. inputs [B,N,C] -> [B,N,C]."""
    B, N, Cin = inputs.shape
    E = rel_rec.shape[0]
    Cout = params["out_fc2_w"].shape[-1]

    # ---- layout plumbing (pure JAX glue, done once per call) ----
    xf = inputs.reshape(B * N, Cin)
    eye_b = jnp.eye(B, dtype=inputs.dtype)
    rrec_f = jnp.kron(eye_b, rel_rec)            # [B*E, B*N]
    rsend_f = jnp.kron(eye_b, rel_send)          # [B*E, B*N]
    rrec_t = rrec_f.T                            # [B*N, B*E]

    rt = rel_type.reshape(B * E, 2)
    if skip_first:                               # skipping edge type 0 == weighting it by 0
        rt = rt.at[:, 0].set(0.0)
    rt0, rt1 = rt[:, 0:1], rt[:, 1:2]            # [B*E, 1] each

    # msg_fc1: stack both edge types along the output (lane) axis and split
    # the input axis into sender / receiver halves.
    w1 = params["msg_fc1_w"]                     # [2, 2*Cin, Cout]
    w1s = jnp.concatenate([w1[0, :Cin], w1[1, :Cin]], axis=1)   # [Cin, 2*Cout]
    w1r = jnp.concatenate([w1[0, Cin:], w1[1, Cin:]], axis=1)   # [Cin, 2*Cout]
    b1 = jnp.concatenate([params["msg_fc1_b"][0], params["msg_fc1_b"][1]])[None, :]

    # msg_fc2: block-diagonal fusion of the two edge types.
    w2 = params["msg_fc2_w"]                     # [2, Cout, Cout]
    zero = jnp.zeros((Cout, Cout), w2.dtype)
    w2_blk = jnp.block([[w2[0], zero], [zero, w2[1]]])          # [2*Cout, 2*Cout]
    b2 = jnp.concatenate([params["msg_fc2_b"][0], params["msg_fc2_b"][1]])[None, :]

    # out_fc1: split into the inputs-part and agg_msgs-part (avoids in-kernel concat).
    wo1 = params["out_fc1_w"]                    # [Cin + Cout, Cout]
    wo1x, wo1m = wo1[:Cin], wo1[Cin:]
    bo1 = params["out_fc1_b"][None, :]
    wo2, bo2 = params["out_fc2_w"], params["out_fc2_b"][None, :]

    vmem = pl.BlockSpec(memory_space=pltpu.MemorySpace.VMEM)
    out = pl.pallas_call(
        nri_conv_kernel,
        out_shape=jax.ShapeDtypeStruct((B * N, Cout), jnp.float32),
        in_specs=[vmem] * 16,
        out_specs=vmem,
    )(xf, rrec_f, rsend_f, rrec_t, rt0, rt1,
      w1s, w1r, b1, w2_blk, b2, wo1x, wo1m, bo1, wo2, bo2)
    return out.reshape(B, N, Cout)


# ----------------------------------------------------------------------------- reference
def reference_forward(inputs, rel_rec, rel_send, rel_type, params, skip_first=False):
    """Pure-JAX reference mirroring the PyTorch NRIConv.forward (dropout=0)."""
    receivers = jnp.einsum("en,bnc->bec", rel_rec, inputs)
    senders = jnp.einsum("en,bnc->bec", rel_send, inputs)
    pre_msg = jnp.concatenate([senders, receivers], axis=-1)
    B, E = pre_msg.shape[0], pre_msg.shape[1]
    Cout = params["msg_fc2_w"].shape[-1]
    all_msgs = jnp.zeros((B, E, Cout), jnp.float32)
    start_idx = 1 if skip_first else 0
    for i in range(start_idx, 2):
        msg = jax.nn.relu(pre_msg @ params["msg_fc1_w"][i] + params["msg_fc1_b"][i])
        msg = jax.nn.relu(msg @ params["msg_fc2_w"][i] + params["msg_fc2_b"][i])
        msg = msg * rel_type[:, :, i:i + 1]
        all_msgs = all_msgs + msg
    # all_msgs.transpose(-2,-1) @ rel_rec, transposed back  == einsum('bec,en->bnc')
    agg_msgs = jnp.einsum("bec,en->bnc", all_msgs, rel_rec)
    aug_inputs = jnp.concatenate([inputs, agg_msgs], axis=-1)
    pred = jax.nn.relu(aug_inputs @ params["out_fc1_w"] + params["out_fc1_b"])
    pred = jax.nn.relu(pred @ params["out_fc2_w"] + params["out_fc2_b"])
    return inputs + pred


# ----------------------------------------------------------------------------- init helpers
def _xavier(key, shape):
    fan_in, fan_out = shape[-2], shape[-1]
    bound = float(np.sqrt(6.0 / (fan_in + fan_out)))
    return jax.random.uniform(key, shape, jnp.float32, -bound, bound)


def _bias(key, shape, fan_in):
    bound = 1.0 / float(np.sqrt(fan_in))
    return jax.random.uniform(key, shape, jnp.float32, -bound, bound)


if __name__ == "__main__":
    B, N, C = 2, 8, 32            # batch, atoms, in_channels == out_channels (residual)
    E = N * (N - 1)               # fully connected graph without self loops -> 56 edges

    key = jax.random.PRNGKey(0)
    keys = jax.random.split(key, 12)

    inputs = jax.random.normal(keys[0], (B, N, C), jnp.float32)

    # one-hot receiver / sender incidence matrices (standard NRI setup)
    pairs = np.array([(i, j) for i in range(N) for j in range(N) if i != j])
    rel_rec = jnp.asarray(np.eye(N, dtype=np.float32)[pairs[:, 0]])    # [E, N]
    rel_send = jnp.asarray(np.eye(N, dtype=np.float32)[pairs[:, 1]])   # [E, N]
    rel_type = jax.nn.softmax(jax.random.normal(keys[1], (B, E, 2), jnp.float32), axis=-1)

    params = {
        "msg_fc1_w": _xavier(keys[2], (2, 2 * C, C)),
        "msg_fc1_b": _bias(keys[3], (2, C), 2 * C),
        "msg_fc2_w": _xavier(keys[4], (2, C, C)),
        "msg_fc2_b": _bias(keys[5], (2, C), C),
        "out_fc1_w": _xavier(keys[6], (2 * C, C)),
        "out_fc1_b": _bias(keys[7], (C,), 2 * C),
        "out_fc2_w": _xavier(keys[8], (C, C)),
        "out_fc2_b": _bias(keys[9], (C,), C),
    }

    out = nri_conv_forward(inputs, rel_rec, rel_send, rel_type, params)
    jax.block_until_ready(out)

    ref = reference_forward(inputs, rel_rec, rel_send, rel_type, params)
    # f32 math throughout; slack accounts for TPU default matmul precision
    # (bf16 passes) interacting with the fused/restructured contraction order.
    np.testing.assert_allclose(np.asarray(out), np.asarray(ref), rtol=5e-3, atol=5e-3)

    print("KERNEL_OK")
</pallas_src>

<mosaic_0001>
module attributes {stable_mosaic.version = 11 : i64} {
  func.func @nri_conv_kernel(%arg0: memref<16x32xf32, #tpu.memory_space<vmem>>, %arg1: memref<112x16xf32, #tpu.memory_space<vmem>>, %arg2: memref<112x16xf32, #tpu.memory_space<vmem>>, %arg3: memref<16x112xf32, #tpu.memory_space<vmem>>, %arg4: memref<112x1xf32, #tpu.memory_space<vmem>>, %arg5: memref<112x1xf32, #tpu.memory_space<vmem>>, %arg6: memref<32x64xf32, #tpu.memory_space<vmem>>, %arg7: memref<32x64xf32, #tpu.memory_space<vmem>>, %arg8: memref<1x64xf32, #tpu.memory_space<vmem>>, %arg9: memref<64x64xf32, #tpu.memory_space<vmem>>, %arg10: memref<1x64xf32, #tpu.memory_space<vmem>>, %arg11: memref<32x32xf32, #tpu.memory_space<vmem>>, %arg12: memref<32x32xf32, #tpu.memory_space<vmem>>, %arg13: memref<1x32xf32, #tpu.memory_space<vmem>>, %arg14: memref<32x32xf32, #tpu.memory_space<vmem>>, %arg15: memref<1x32xf32, #tpu.memory_space<vmem>>, %arg16: memref<16x32xf32, #tpu.memory_space<vmem>>) attributes {dimension_semantics = [], scalar_prefetch = 0 : i64, scratch_operands = 0 : i64, tpu.core_type = #tpu.core_type<tc>} {
    %c0 = arith.constant 0 : index
    %c0_0 = arith.constant 0 : index
    %0 = vector.load %arg0[%c0, %c0_0] : memref<16x32xf32, #tpu.memory_space<vmem>>, vector<16x32xf32>
    %c0_1 = arith.constant 0 : index
    %c0_2 = arith.constant 0 : index
    %1 = vector.load %arg2[%c0_1, %c0_2] : memref<112x16xf32, #tpu.memory_space<vmem>>, vector<112x16xf32>
    %cst = arith.constant dense<0.000000e+00> : vector<112x32xf32>
    %2 = tpu.matmul %1, %0, %cst {dimension_numbers = #tpu.dot_dimension_numbers<[1], [0], [0], [1], [0, 0, 1, 1], [], []>} : vector<112x16xf32>, vector<16x32xf32>, vector<112x32xf32> -> vector<112x32xf32>
    %c0_3 = arith.constant 0 : index
    %c0_4 = arith.constant 0 : index
    %3 = vector.load %arg1[%c0_3, %c0_4] : memref<112x16xf32, #tpu.memory_space<vmem>>, vector<112x16xf32>
    %cst_5 = arith.constant dense<0.000000e+00> : vector<112x32xf32>
    %4 = tpu.matmul %3, %0, %cst_5 {dimension_numbers = #tpu.dot_dimension_numbers<[1], [0], [0], [1], [0, 0, 1, 1], [], []>} : vector<112x16xf32>, vector<16x32xf32>, vector<112x32xf32> -> vector<112x32xf32>
    %c0_6 = arith.constant 0 : index
    %c0_7 = arith.constant 0 : index
    %5 = vector.load %arg6[%c0_6, %c0_7] : memref<32x64xf32, #tpu.memory_space<vmem>>, vector<32x64xf32>
    %cst_8 = arith.constant dense<0.000000e+00> : vector<112x64xf32>
    %6 = tpu.matmul %2, %5, %cst_8 {dimension_numbers = #tpu.dot_dimension_numbers<[1], [0], [0], [1], [0, 0, 1, 1], [], []>} : vector<112x32xf32>, vector<32x64xf32>, vector<112x64xf32> -> vector<112x64xf32>
    %c0_9 = arith.constant 0 : index
    %c0_10 = arith.constant 0 : index
    %7 = vector.load %arg7[%c0_9, %c0_10] : memref<32x64xf32, #tpu.memory_space<vmem>>, vector<32x64xf32>
    %cst_11 = arith.constant dense<0.000000e+00> : vector<112x64xf32>
    %8 = tpu.matmul %4, %7, %cst_11 {dimension_numbers = #tpu.dot_dimension_numbers<[1], [0], [0], [1], [0, 0, 1, 1], [], []>} : vector<112x32xf32>, vector<32x64xf32>, vector<112x64xf32> -> vector<112x64xf32>
    %9 = arith.addf %6, %8 : vector<112x64xf32>
    %c0_12 = arith.constant 0 : index
    %c0_13 = arith.constant 0 : index
    %10 = vector.load %arg8[%c0_12, %c0_13] : memref<1x64xf32, #tpu.memory_space<vmem>>, vector<1x64xf32>
    %11 = vector.broadcast %10 : vector<1x64xf32> to vector<112x64xf32>
    %12 = arith.addf %9, %11 : vector<112x64xf32>
    %cst_14 = arith.constant 0.000000e+00 : f32
    %13 = vector.broadcast %cst_14 : f32 to vector<112x64xf32>
    %14 = arith.maximumf %12, %13 : vector<112x64xf32>
    %c0_15 = arith.constant 0 : index
    %c0_16 = arith.constant 0 : index
    %15 = vector.load %arg9[%c0_15, %c0_16] : memref<64x64xf32, #tpu.memory_space<vmem>>, vector<64x64xf32>
    %cst_17 = arith.constant dense<0.000000e+00> : vector<112x64xf32>
    %16 = tpu.matmul %14, %15, %cst_17 {dimension_numbers = #tpu.dot_dimension_numbers<[1], [0], [0], [1], [0, 0, 1, 1], [], []>} : vector<112x64xf32>, vector<64x64xf32>, vector<112x64xf32> -> vector<112x64xf32>
    %c0_18 = arith.constant 0 : index
    %c0_19 = arith.constant 0 : index
    %17 = vector.load %arg10[%c0_18, %c0_19] : memref<1x64xf32, #tpu.memory_space<vmem>>, vector<1x64xf32>
    %18 = vector.broadcast %17 : vector<1x64xf32> to vector<112x64xf32>
    %19 = arith.addf %16, %18 : vector<112x64xf32>
    %cst_20 = arith.constant 0.000000e+00 : f32
    %20 = vector.broadcast %cst_20 : f32 to vector<112x64xf32>
    %21 = arith.maximumf %19, %20 : vector<112x64xf32>
    %c0_21 = arith.constant 0 : index
    %c0_22 = arith.constant 0 : index
    %22 = vector.load %arg4[%c0_21, %c0_22] : memref<112x1xf32, #tpu.memory_space<vmem>>, vector<112x1xf32>
    %23 = vector.extract_strided_slice %21 {offsets = [0, 0], sizes = [112, 32], strides = [1, 1]} : vector<112x64xf32> to vector<112x32xf32>
    %24 = vector.broadcast %22 : vector<112x1xf32> to vector<112x32xf32>
    %25 = arith.mulf %24, %23 : vector<112x32xf32>
    %c0_23 = arith.constant 0 : index
    %c0_24 = arith.constant 0 : index
    %26 = vector.load %arg5[%c0_23, %c0_24] : memref<112x1xf32, #tpu.memory_space<vmem>>, vector<112x1xf32>
    %27 = vector.extract_strided_slice %21 {offsets = [0, 32], sizes = [112, 32], strides = [1, 1]} : vector<112x64xf32> to vector<112x32xf32>
    %28 = vector.broadcast %26 : vector<112x1xf32> to vector<112x32xf32>
    %29 = arith.mulf %28, %27 : vector<112x32xf32>
    %30 = arith.addf %25, %29 : vector<112x32xf32>
    %c0_25 = arith.constant 0 : index
    %c0_26 = arith.constant 0 : index
    %31 = vector.load %arg3[%c0_25, %c0_26] : memref<16x112xf32, #tpu.memory_space<vmem>>, vector<16x112xf32>
    %cst_27 = arith.constant dense<0.000000e+00> : vector<16x32xf32>
    %32 = tpu.matmul %31, %30, %cst_27 {dimension_numbers = #tpu.dot_dimension_numbers<[1], [0], [0], [1], [0, 0, 1, 1], [], []>} : vector<16x112xf32>, vector<112x32xf32>, vector<16x32xf32> -> vector<16x32xf32>
    %c0_28 = arith.constant 0 : index
    %c0_29 = arith.constant 0 : index
    %33 = vector.load %arg11[%c0_28, %c0_29] : memref<32x32xf32, #tpu.memory_space<vmem>>, vector<32x32xf32>
    %cst_30 = arith.constant dense<0.000000e+00> : vector<16x32xf32>
    %34 = tpu.matmul %0, %33, %cst_30 {dimension_numbers = #tpu.dot_dimension_numbers<[1], [0], [0], [1], [0, 0, 1, 1], [], []>} : vector<16x32xf32>, vector<32x32xf32>, vector<16x32xf32> -> vector<16x32xf32>
    %c0_31 = arith.constant 0 : index
    %c0_32 = arith.constant 0 : index
    %35 = vector.load %arg12[%c0_31, %c0_32] : memref<32x32xf32, #tpu.memory_space<vmem>>, vector<32x32xf32>
    %cst_33 = arith.constant dense<0.000000e+00> : vector<16x32xf32>
    %36 = tpu.matmul %32, %35, %cst_33 {dimension_numbers = #tpu.dot_dimension_numbers<[1], [0], [0], [1], [0, 0, 1, 1], [], []>} : vector<16x32xf32>, vector<32x32xf32>, vector<16x32xf32> -> vector<16x32xf32>
    %37 = arith.addf %34, %36 : vector<16x32xf32>
    %c0_34 = arith.constant 0 : index
    %c0_35 = arith.constant 0 : index
    %38 = vector.load %arg13[%c0_34, %c0_35] : memref<1x32xf32, #tpu.memory_space<vmem>>, vector<1x32xf32>
    %39 = vector.broadcast %38 : vector<1x32xf32> to vector<16x32xf32>
    %40 = arith.addf %37, %39 : vector<16x32xf32>
    %cst_36 = arith.constant 0.000000e+00 : f32
    %41 = vector.broadcast %cst_36 : f32 to vector<16x32xf32>
    %42 = arith.maximumf %40, %41 : vector<16x32xf32>
    %c0_37 = arith.constant 0 : index
    %c0_38 = arith.constant 0 : index
    %43 = vector.load %arg14[%c0_37, %c0_38] : memref<32x32xf32, #tpu.memory_space<vmem>>, vector<32x32xf32>
    %cst_39 = arith.constant dense<0.000000e+00> : vector<16x32xf32>
    %44 = tpu.matmul %42, %43, %cst_39 {dimension_numbers = #tpu.dot_dimension_numbers<[1], [0], [0], [1], [0, 0, 1, 1], [], []>} : vector<16x32xf32>, vector<32x32xf32>, vector<16x32xf32> -> vector<16x32xf32>
    %c0_40 = arith.constant 0 : index
    %c0_41 = arith.constant 0 : index
    %45 = vector.load %arg15[%c0_40, %c0_41] : memref<1x32xf32, #tpu.memory_space<vmem>>, vector<1x32xf32>
    %46 = vector.broadcast %45 : vector<1x32xf32> to vector<16x32xf32>
    %47 = arith.addf %44, %46 : vector<16x32xf32>
    %cst_42 = arith.constant 0.000000e+00 : f32
    %48 = vector.broadcast %cst_42 : f32 to vector<16x32xf32>
    %49 = arith.maximumf %47, %48 : vector<16x32xf32>
    %50 = arith.addf %0, %49 : vector<16x32xf32>
    %c0_43 = arith.constant 0 : index
    %c0_44 = arith.constant 0 : index
    %51 = vector.load %arg16[%c0_43, %c0_44] : memref<16x32xf32, #tpu.memory_space<vmem>>, vector<16x32xf32>
    tpu.vector_store %arg16[%c0_43, %c0_44], %50 {strides = array<i32>} : memref<16x32xf32, #tpu.memory_space<vmem>>, vector<16x32xf32>,
    return
  }
}

</mosaic_0001>

<bundles_post_ra>
// kernel: tpu_custom_call.1
= control target key start
LH: loop header
LB: loop body
LE: loop exit
PB: predicated region body
PF: predicated region fallthrough
CT: control target
= control target key end

     0   :  { %s2839_s0 = inlined_call_operand.vmem [shape: f32[16,32], index: 0, kind: input, shape index: {}]   ;;  %s2840_s1 = inlined_call_operand.vmem [shape: f32[112,16], index: 1, kind: input, shape index: {}]   ;;  %s2841_s2 = inlined_call_operand.vmem [shape: f32[112,16], index: 2, kind: input, shape index: {}]   ;;  %s2842_s3 = inlined_call_operand.vmem [shape: f32[16,112], index: 3, kind: input, shape index: {}]   ;;  %s2843_s4 = inlined_call_operand.vmem [shape: f32[112,1], index: 4, kind: input, shape index: {}]   ;;  %s2844_s5 = inlined_call_operand.vmem [shape: f32[112,1], index: 5, kind: input, shape index: {}]   ;;  %s2845_s6 = inlined_call_operand.vmem [shape: f32[32,64], index: 6, kind: input, shape index: {}]   ;;  %s2846_s7 = inlined_call_operand.vmem [shape: f32[32,64], index: 7, kind: input, shape index: {}]   ;;  %s2847_s8 = inlined_call_operand.vmem [shape: f32[1,64], index: 8, kind: input, shape index: {}]   ;;  %s2848_s9 = inlined_call_operand.vmem [shape: f32[64,64], index: 9, kind: input, shape index: {}]   ;;  %s2849_s10 = inlined_call_operand.vmem [shape: f32[1,64], index: 10, kind: input, shape index: {}]   ;;  %s2850_s11 = inlined_call_operand.vmem [shape: f32[32,32], index: 11, kind: input, shape index: {}]   ;;  %s2851_s12 = inlined_call_operand.vmem [shape: f32[32,32], index: 12, kind: input, shape index: {}]   ;;  %s2852_s13 = inlined_call_operand.vmem [shape: f32[1,32], index: 13, kind: input, shape index: {}]   ;;  %s2853_s14 = inlined_call_operand.vmem [shape: f32[32,32], index: 14, kind: input, shape index: {}]   ;;  %s2854_s15 = inlined_call_operand.vmem [shape: f32[1,32], index: 15, kind: input, shape index: {}]   ;;  %s2855_s16 = inlined_call_operand.hbm [shape: f32[16,32], index: 16, kind: output, shape index: {}]  }
   0x1   :  { %2857 = sst [smem:[#allocation5_spill]] %s2839_s0 }
   0x2   :  { %s2858_s23 = sld [smem:[#allocation5_spill]]  ;;  %vm70_vm0 = vcmask 130048   ;;  %v248_v2 = vld [vmem:[%s2840_s1] sm:$0xff]  ;;  %v249_v4 = vld [vmem:[%s2840_s1 + $0x8] sm:$0xff]  ;;  %v250_v5 = vld [vmem:[%s2840_s1 + $0x10] sm:$0xff] }
   0x3   :  { %1924 = vmatprep.mubr.msk.f32.mxu1 %vm70_vm0, %v248_v2  ;;  %v56_v6 = vld [vmem:[%s2841_s2] sm:$0xff]  ;;  %v57_v7 = vld [vmem:[%s2841_s2 + $0x8] sm:$0xff]  ;;  %v58_v8 = vld [vmem:[%s2841_s2 + $0x10] sm:$0xff] }
   0x4   :  { %1899 = vmatprep.mubr.msk.f32.mxu0 %vm70_vm0, %v56_v6  ;;  %v251_v9 = vld [vmem:[%s2840_s1 + $0x18] sm:$0xff]  ;;  %v252_v11 = vld [vmem:[%s2840_s1 + $0x20] sm:$0xff]  ;;  %v444_v14 = vld [vmem:[%s2846_s7 + $0x8] sm:$0xff] }
   0x5   :  { %v59_v10 = vld [vmem:[%s2841_s2 + $0x18] sm:$0xff]  ;;  %v60_v12 = vld [vmem:[%s2841_s2 + $0x20] sm:$0xff]  ;;  %v445_v15 = vld [vmem:[%s2846_s7 + $0x10] sm:$0xff] }
   0x6   :  { %v443_v13 = vld [vmem:[%s2846_s7] sm:$0xff]  ;;  %v446_v17 = vld [vmem:[%s2846_s7 + $0x18] sm:$0xff] }
   0x7   :  { %v2112_v16 = vpack.c.bf16 %v444_v14, %v443_v13 }
   0x8   :  { %v2336_v0 = vld [vmem:[%s2858_s23] sm:$0xff]  ;;  %v2341_v1 = vld [vmem:[%s2858_s23 + $0x8] sm:$0xff] }
   0x9   :  { %v2104_v3 = vpack.c.bf16 %v2341_v1, %v2336_v0 }
   0xb   :  { %2109 = vmatprep.subr.bf16.mxu1 %v2104_v3  ;;  %2105 = vmatprep.subr.bf16.mxu0 %v2104_v3 }
   0xc   :  { %2111 = vmatpush3.bf16.msra.mxu1 %v2104_v3  ;;  %2107 = vmatpush3.bf16.msra.mxu0 %v2104_v3 }
   0xf   :  { %1925 = vmatmul.mubr.msk.f32.vlgmr.msra.gmra.mrb[0].mxu1 %vm70_vm0, %v249_v4  ;;  %1900 = vmatmul.mubr.msk.f32.vlgmr.msra.gmra.mrb[0].mxu0 %vm70_vm0, %v57_v7 }
  0x10   :  { %1927 = vmatprep.mubr.msk.f32.mxu1 %vm70_vm0, %v250_v5  ;;  %1902 = vmatprep.mubr.msk.f32.mxu0 %vm70_vm0, %v58_v8 }
  0x13   :  { %1928 = vmatmul.mubr.msk.f32.gmra.mrb[2].mxu1 %vm70_vm0, %v251_v9  ;;  %1903 = vmatmul.mubr.msk.f32.gmra.mrb[2].mxu0 %vm70_vm0, %v59_v10 }
  0x14   :  { %21 = vsyncpa [#allocation3], 0  ;;  %1930 = vmatprep.mubr.msk.f32.mxu1 %vm70_vm0, %v252_v11  ;;  %v253_v18 = vld [vmem:[%s2840_s1 + $0x28] sm:$0xff]  ;;  %1905 = vmatprep.mubr.msk.f32.mxu0 %vm70_vm0, %v60_v12  ;;  %v254_v20 = vld [vmem:[%s2840_s1 + $0x30] sm:$0xff]  ;;  %v2116_v22 = vpack.c.bf16 %v446_v17, %v445_v15  ;;  %vm447_vm1 = vcmask 261120   ;;  %vm852_vm2 = vcmask 523264  }
  0x15   :  { %v61_v19 = vld [vmem:[%s2841_s2 + $0x28] sm:$0xff]  ;;  %v62_v21 = vld [vmem:[%s2841_s2 + $0x30] sm:$0xff]  ;;  %2113 = vmatprep.subr.bf16.mxu0 %v2112_v16  ;;  %v255_v23 = vld [vmem:[%s2840_s1 + $0x38] sm:$0xff]  ;;  %vm1312_vm3 = vcmask 916480  }
  0x16   :  { %2115 = vmatpush3.bf16.msra.mxu0 %v2112_v16  ;;  %v63_v24 = vld [vmem:[%s2841_s2 + $0x38] sm:$0xff]  ;;  %v256_v25 = vld [vmem:[%s2840_s1 + $0x40] sm:$0xff]  ;;  %v257_v27 = vld [vmem:[%s2840_s1 + $0x48] sm:$0xff] }
  0x17   :  { %1931 = vmatmul.mubr.msk.f32.gmra.mrb[4].mxu1 %vm70_vm0, %v253_v18  ;;  %1906 = vmatmul.mubr.msk.f32.gmra.mrb[4].mxu0 %vm70_vm0, %v61_v19  ;;  %v64_v26 = vld [vmem:[%s2841_s2 + $0x40] sm:$0xff]  ;;  %v65_v28 = vld [vmem:[%s2841_s2 + $0x48] sm:$0xff]  ;;  %v258_v29 = vld [vmem:[%s2840_s1 + $0x50] sm:$0xff] }
  0x18   :  { %1933 = vmatprep.mubr.msk.f32.mxu1 %vm70_vm0, %v254_v20  ;;  %1908 = vmatprep.mubr.msk.f32.mxu0 %vm70_vm0, %v62_v21  ;;  %v66_v30 = vld [vmem:[%s2841_s2 + $0x50] sm:$0xff]  ;;  %v259_v31 = vld [vmem:[%s2840_s1 + $0x58] sm:$0xff]  ;;  %v260_v33 = vld [vmem:[%s2840_s1 + $0x60] sm:$0xff] }
  0x19   :  { %2117 = vmatprep.subr.bf16.mxu0 %v2116_v22  ;;  %v67_v32 = vld [vmem:[%s2841_s2 + $0x58] sm:$0xff]  ;;  %v68_v34 = vld [vmem:[%s2841_s2 + $0x60] sm:$0xff]  ;;  %v261_v35 = vld [vmem:[%s2840_s1 + $0x68] sm:$0xff] }
  0x1a   :  { %2119 = vmatpush3.bf16.msra.mxu0 %v2116_v22  ;;  %v69_v36 = vld [vmem:[%s2841_s2 + $0x68] sm:$0xff]  ;;  %v439_v37 = vld [vmem:[%s2845_s6] sm:$0xff]  ;;  %v839_v42 = vld [vmem:[%s2848_s9 + $0x10] sm:$0xff] }
  0x1b   :  { %1934 = vmatmul.mubr.msk.f32.gmra.mrb[6].mxu1 %vm70_vm0, %v255_v23  ;;  %1909 = vmatmul.mubr.msk.f32.gmra.mrb[6].mxu0 %vm70_vm0, %v63_v24  ;;  %v440_v38 = vld [vmem:[%s2845_s6 + $0x8] sm:$0xff]  ;;  %v837_v40 = vld [vmem:[%s2848_s9] sm:$0xff]  ;;  %v840_v44 = vld [vmem:[%s2848_s9 + $0x18] sm:$0xff]  ;;  %v2243_v23 = vmov 0  }
  0x1c   :  { %1936 = vmatprep.mubr.msk.f32.mxu1 %vm70_vm0, %v256_v25  ;;  %1911 = vmatprep.mubr.msk.f32.mxu0 %vm70_vm0, %v64_v26  ;;  %v2120_v39 = vpack.c.bf16 %v440_v38, %v439_v37  ;;  %v838_v41 = vld [vmem:[%s2848_s9 + $0x8] sm:$0xff]  ;;  %v2132_v45 = vpack.c.bf16 %v840_v44, %v839_v42  ;;  %v841_v46 = vld [vmem:[%s2848_s9 + $0x20] sm:$0xff]  ;;  %v441_v49 = vld [vmem:[%s2845_s6 + $0x10] sm:$0xff] }
  0x1d   :  { %v2128_v43 = vpack.c.bf16 %v838_v41, %v837_v40  ;;  %v842_v47 = vld [vmem:[%s2848_s9 + $0x28] sm:$0xff]  ;;  %v442_v50 = vld [vmem:[%s2845_s6 + $0x18] sm:$0xff]  ;;  %v843_v18 = vld [vmem:[%s2848_s9 + $0x30] sm:$0xff]  ;;  %2217 = vset.pattern.permute.xlu0 %v2243_v23  ;;  %2218 = vset.pattern.permute.xlu1 %v2243_v23 }
  0x1e   :  { %2121 = vmatprep.subr.bf16.mxu0 %v2120_v39  ;;  %v2136_v48 = vpack.c.bf16 %v842_v47, %v841_v46  ;;  %v2124_v54 = vpack.c.bf16 %v442_v50, %v441_v49  ;;  %v844_v19 = vld [vmem:[%s2848_s9 + $0x38] sm:$0xff]  ;;  %v1142_v21 = vld [vmem:[%s2844_s5] sm:$0xff]  ;;  %v1144_v22 = vld [vmem:[%s2844_s5 + $0x10] sm:$0xff] }
  0x1f   :  { %1937 = vmatmul.mubr.msk.f32.gmra.mrb[8].mxu1 %vm70_vm0, %v257_v27  ;;  %1912 = vmatmul.mubr.msk.f32.gmra.mrb[8].mxu0 %vm70_vm0, %v65_v28  ;;  %v2140_v20 = vpack.c.bf16 %v844_v19, %v843_v18  ;;  %v1143_v24 = vld [vmem:[%s2844_s5 + $0x8] sm:$0xff]  ;;  %v1145_v25 = vld [vmem:[%s2844_s5 + $0x18] sm:$0xff]  ;;  %v1146_v26 = vld [vmem:[%s2844_s5 + $0x20] sm:$0xff] }
  0x20   :  { %1939 = vmatprep.mubr.msk.f32.mxu1 %vm70_vm0, %v258_v29  ;;  %1914 = vmatprep.mubr.msk.f32.mxu0 %vm70_vm0, %v66_v30  ;;  %v1147_v27 = vld [vmem:[%s2844_s5 + $0x28] sm:$0xff]  ;;  %v1148_v28 = vld [vmem:[%s2844_s5 + $0x30] sm:$0xff]  ;;  %v1149_v29 = vld [vmem:[%s2844_s5 + $0x38] sm:$0xff] }
  0x21   :  { %2129 = vmatprep.subr.bf16.mxu1 %v2128_v43  ;;  %1158 = vperm.xlu0 %2217, %v1142_v21   ;;  %v1150_v30 = vld [vmem:[%s2844_s5 + $0x40] sm:$0xff]  ;;  %v1045_v37 = vld [vmem:[%s2843_s4 + $0x8] sm:$0xff]  ;;  %v1046_v38 = vld [vmem:[%s2843_s4 + $0x10] sm:$0xff] }
  0x22   :  { %2131 = vmatpush3.bf16.msra.mxu1 %v2128_v43  ;;  %1168 = vperm.xlu1 %2218, %v1144_v22   ;;  %v1048_v40 = vld [vmem:[%s2843_s4 + $0x20] sm:$0xff]  ;;  %v1049_v41 = vld [vmem:[%s2843_s4 + $0x28] sm:$0xff]  ;;  %v1050_v42 = vld [vmem:[%s2843_s4 + $0x30] sm:$0xff] }
  0x23   :  { %1940 = vmatmul.mubr.msk.f32.gmra.mrb[10].mxu1 %vm70_vm0, %v259_v31  ;;  %1915 = vmatmul.mubr.msk.f32.gmra.mrb[10].mxu0 %vm70_vm0, %v67_v32  ;;  %v1151_v31 = vld [vmem:[%s2844_s5 + $0x48] sm:$0xff]  ;;  %v1152_v32 = vld [vmem:[%s2844_s5 + $0x50] sm:$0xff]  ;;  %v1051_v43 = vld [vmem:[%s2843_s4 + $0x38] sm:$0xff] }
  0x24   :  { %1942 = vmatprep.mubr.msk.f32.mxu1 %vm70_vm0, %v260_v33  ;;  %1917 = vmatprep.mubr.msk.f32.mxu0 %vm70_vm0, %v68_v34  ;;  %v1153_v33 = vld [vmem:[%s2844_s5 + $0x58] sm:$0xff]  ;;  %v1154_v34 = vld [vmem:[%s2844_s5 + $0x60] sm:$0xff]  ;;  %v1054_v46 = vld [vmem:[%s2843_s4 + $0x50] sm:$0xff] }
  0x25   :  { %2133 = vmatprep.subr.bf16.mxu1 %v2132_v45  ;;  %1163 = vperm.xlu0 %2217, %v1143_v24   ;;  %v1052_v44 = vld [vmem:[%s2843_s4 + $0x40] sm:$0xff]  ;;  %v1055_v47 = vld [vmem:[%s2843_s4 + $0x58] sm:$0xff]  ;;  %v1057_v49 = vld [vmem:[%s2843_s4 + $0x68] sm:$0xff] }
  0x26   :  { %2135 = vmatpush3.bf16.msra.mxu1 %v2132_v45  ;;  %1173 = vperm.xlu1 %2218, %v1145_v25   ;;  %v1053_v45 = vld [vmem:[%s2843_s4 + $0x48] sm:$0xff]  ;;  %v1745_v50 = vld [vmem:[%s2847_s8] ss:$0 sm:$0xff] }
  0x27   :  { %1943 = vmatmul.mubr.msk.f32.gmra.mrb[12].mxu1 %vm70_vm0, %v261_v35  ;;  %1918 = vmatmul.mubr.msk.f32.gmra.mrb[12].mxu0 %vm70_vm0, %v69_v36  ;;  %v1155_v35 = vld [vmem:[%s2844_s5 + $0x68] sm:$0xff]  ;;  %v1044_v36 = vld [vmem:[%s2843_s4] sm:$0xff] }
  0x28   :  { %2137 = vmatprep.subr.bf16.mxu1 %v2136_v48 }
  0x29   :  { %1178 = vperm.xlu0 %2217, %v1146_v26  }
  0x2a   :  { %2139 = vmatpush3.bf16.msra.mxu1 %v2136_v48  ;;  %1183 = vperm.xlu1 %2218, %v1147_v27   ;;  %v1056_v48 = vld [vmem:[%s2843_s4 + $0x60] sm:$0xff] }
  0x2b   :  { %2141 = vmatprep.subr.bf16.mxu1 %v2140_v20 }
  0x2d   :  { %1188 = vperm.xlu0 %2217, %v1148_v28  }
  0x2e   :  { %2143 = vmatpush3.bf16.msra.mxu1 %v2140_v20  ;;  %1193 = vperm.xlu1 %2218, %v1149_v29  }
  0x31   :  { %1198 = vperm.xlu0 %2217, %v1150_v30  }
  0x32   :  { %1203 = vperm.xlu1 %2218, %v1151_v31  }
  0x35   :  { %1208 = vperm.xlu0 %2217, %v1152_v32  }
  0x36   :  { %1213 = vperm.xlu1 %2218, %v1153_v33  }
  0x39   :  { %1218 = vperm.xlu0 %2217, %v1154_v34   ;;  %v2637_v34 = vld [vmem:[%s2849_s10] ss:$0 sm:$0xff]  ;;  %s2244_s10 = smov 96  }
  0x3a   :  { %1223 = vperm.xlu1 %2218, %v1155_v35  }
  0x3d   :  { %1060 = vperm.xlu0 %2217, %v1044_v36  }
  0x3e   :  { %1065 = vperm.xlu1 %2218, %v1045_v37  }
  0x41   :  { %1070 = vperm.xlu0 %2217, %v1046_v38  }
  0x45   :  { %1080 = vperm.xlu0 %2217, %v1048_v40  }
  0x49   :  { %1090 = vperm.xlu0 %2217, %v1050_v42  }
  0x4d   :  { %1100 = vperm.xlu0 %2217, %v1052_v44  }
  0x51   :  { %1110 = vperm.xlu0 %2217, %v1054_v46  }
  0x55   :  { %1120 = vperm.xlu0 %2217, %v1056_v48  }
  0xa0   :  { %v1159_v32 = vpop.permute.xlu0 %1158 }
  0xa1   :  { %v1169_v31 = vpop.permute.xlu1 %1168 }
  0xa4   :  { %v1164_v35 = vpop.permute.xlu0 %1163 }
  0xa5   :  { %v1174_v33 = vpop.permute.xlu1 %1173 }
  0xa8   :  { %v1179_v44 = vpop.permute.xlu0 %1178 }
  0xe2   :  { %v1926_v51 = vpop.f32.mrb[0].mxu1  ;;  %v1901_v52 = vpop.f32.mrb[0].mxu0 }
  0xe3   :  { %v370_v53 = vpop.f32.mrb[1].mxu1  ;;  %v179_v55 = vpop.f32.mrb[1].mxu0 }
  0xe4   :  { %1953 = vmatprep.mubr.msk.f32.mxu0 %vm447_vm1, %v370_v53 }
  0xe5   :  { %1954 = vmatmul.mubr.msk.f32.vlgmr.msra.gmra.mrb[14].mxu0 %vm447_vm1, %v1926_v51 }
  0xe6   :  { %v1929_v56 = vpop.f32.mrb[2].mxu1  ;;  %2123 = vmatpush3.bf16.msra.mxu0 %v2120_v39  ;;  %v1904_v57 = vpop.f32.mrb[2].mxu0  ;;  %v1047_v39 = vld [vmem:[%s2843_s4 + $0x18] sm:$0xff] }
  0xe7   :  { %v380_v58 = vpop.f32.mrb[3].mxu1  ;;  %2125 = vmatprep.subr.bf16.mxu0 %v2124_v54  ;;  %v189_v59 = vpop.f32.mrb[3].mxu0  ;;  %1075 = vperm.xlu1 %2218, %v1047_v39  }
  0xe8   :  { %1956 = vmatprep.mubr.msk.f32.mxu0 %vm447_vm1, %v380_v58 }
  0xe9   :  { %1957 = vmatmul.mubr.msk.f32.gmra.mrb[16].mxu0 %vm447_vm1, %v1929_v56 }
  0xea   :  { %v1932_v60 = vpop.f32.mrb[4].mxu1  ;;  %2127 = vmatpush3.bf16.msra.mxu0 %v2124_v54  ;;  %v1907_v61 = vpop.f32.mrb[4].mxu0 }
  0xeb   :  { %v390_v62 = vpop.f32.mrb[5].mxu1  ;;  %v199_v63 = vpop.f32.mrb[5].mxu0  ;;  %1085 = vperm.xlu1 %2218, %v1049_v41  }
  0xec   :  { %1959 = vmatprep.mubr.msk.f32.mxu0 %vm447_vm1, %v390_v62  ;;  %v1184_v41 = vpop.permute.xlu1 %1183 }
  0xed   :  { %1960 = vmatmul.mubr.msk.f32.gmra.mrb[18].mxu0 %vm447_vm1, %v1932_v60 }
  0xee   :  { %v1935_v2 = vpop.f32.mrb[6].mxu1  ;;  %v1910_v3 = vpop.f32.mrb[6].mxu0 }
  0xef   :  { %v400_v4 = vpop.f32.mrb[7].mxu1  ;;  %v209_v5 = vpop.f32.mrb[7].mxu0  ;;  %1095 = vperm.xlu1 %2218, %v1051_v43  }
  0xf0   :  { %1962 = vmatprep.mubr.msk.f32.mxu0 %vm447_vm1, %v400_v4 }
  0xf1   :  { %1963 = vmatmul.mubr.msk.f32.gmra.mrb[20].mxu0 %vm447_vm1, %v1935_v2 }
  0xf2   :  { %v1938_v6 = vpop.f32.mrb[8].mxu1  ;;  %v1913_v7 = vpop.f32.mrb[8].mxu0 }
  0xf3   :  { %v410_v8 = vpop.f32.mrb[9].mxu1  ;;  %v219_v9 = vpop.f32.mrb[9].mxu0  ;;  %1105 = vperm.xlu1 %2218, %v1053_v45  }
  0xf4   :  { %1965 = vmatprep.mubr.msk.f32.mxu0 %vm447_vm1, %v410_v8 }
  0xf5   :  { %1966 = vmatmul.mubr.msk.f32.gmra.mrb[22].mxu0 %vm447_vm1, %v1938_v6 }
  0xf6   :  { %v1941_v10 = vpop.f32.mrb[10].mxu1  ;;  %v1916_v11 = vpop.f32.mrb[10].mxu0 }
  0xf7   :  { %v420_v12 = vpop.f32.mrb[11].mxu1  ;;  %v229_v13 = vpop.f32.mrb[11].mxu0  ;;  %1115 = vperm.xlu1 %2218, %v1055_v47  }
  0xf8   :  { %1968 = vmatprep.mubr.msk.f32.mxu0 %vm447_vm1, %v420_v12 }
  0xf9   :  { %1969 = vmatmul.mubr.msk.f32.gmra.mrb[24].mxu0 %vm447_vm1, %v1941_v10 }
  0xfa   :  { %v1944_v14 = vpop.f32.mrb[12].mxu1  ;;  %v1919_v15 = vpop.f32.mrb[12].mxu0 }
  0xfb   :  { %v430_v16 = vpop.f32.mrb[13].mxu1  ;;  %v239_v17 = vpop.f32.mrb[13].mxu0  ;;  %1125 = vperm.xlu1 %2218, %v1057_v49  }
  0xfc   :  { %1971 = vmatprep.mubr.msk.f32.mxu0 %vm447_vm1, %v430_v16 }
  0xfd   :  { %1972 = vmatmul.mubr.msk.f32.gmra.mrb[26].mxu0 %vm447_vm1, %v1944_v14 }
  0xfe   :  { %1982 = vmatprep.mubr.msk.f32.mxu0 %vm447_vm1, %v179_v55 }
 0x101   :  { %1983 = vmatmul.mubr.msk.f32.vlgmr.msra.gmra.mrb[14].mxu0 %vm447_vm1, %v1901_v52 }
 0x102   :  { %1985 = vmatprep.mubr.msk.f32.mxu0 %vm447_vm1, %v189_v59 }
 0x105   :  { %1986 = vmatmul.mubr.msk.f32.gmra.mrb[16].mxu0 %vm447_vm1, %v1904_v57 }
 0x106   :  { %1988 = vmatprep.mubr.msk.f32.mxu0 %vm447_vm1, %v199_v63 }
 0x109   :  { %1989 = vmatmul.mubr.msk.f32.gmra.mrb[18].mxu0 %vm447_vm1, %v1907_v61 }
 0x10a   :  { %1991 = vmatprep.mubr.msk.f32.mxu0 %vm447_vm1, %v209_v5 }
 0x10d   :  { %1992 = vmatmul.mubr.msk.f32.gmra.mrb[20].mxu0 %vm447_vm1, %v1910_v3 }
 0x10e   :  { %1994 = vmatprep.mubr.msk.f32.mxu0 %vm447_vm1, %v219_v9 }
 0x111   :  { %1995 = vmatmul.mubr.msk.f32.gmra.mrb[22].mxu0 %vm447_vm1, %v1913_v7 }
 0x112   :  { %1997 = vmatprep.mubr.msk.f32.mxu0 %vm447_vm1, %v229_v13 }
 0x115   :  { %1998 = vmatmul.mubr.msk.f32.gmra.mrb[24].mxu0 %vm447_vm1, %v1916_v11 }
 0x116   :  { %2000 = vmatprep.mubr.msk.f32.mxu0 %vm447_vm1, %v239_v17 }
 0x119   :  { %2001 = vmatmul.mubr.msk.f32.gmra.mrb[26].mxu0 %vm447_vm1, %v1919_v15 }
 0x1d4   :  { %v1984_v51 = vpop.f32.mrb[14].mxu0 }
 0x1d5   :  { %v810_v52 = vadd.f32 %v1984_v51, %v1745_v50  ;;  %v733_v53 = vpop.f32.mrb[15].mxu0 }
 0x1d6   :  { %v809_v54 = vadd.f32 %v1745_v50, %v733_v53 }
 0x1d7   :  { %v824_v57 = vmax.f32 %v810_v52, 0.0 }
 0x1d8   :  { %v823_v55 = vmax.f32 %v809_v54, 0.0  ;;  %v1987_v56 = vpop.f32.mrb[16].mxu0 }
 0x1d9   :  { %v812_v58 = vadd.f32 %v1987_v56, %v1745_v50  ;;  %v743_v59 = vpop.f32.mrb[17].mxu0  ;;  %v1194_v56 = vpop.permute.xlu1 %1193 }
 0x1da   :  { %v811_v60 = vadd.f32 %v1745_v50, %v743_v59  ;;  %2019 = vmatprep.mubr.msk.f32.mxu1 %vm852_vm2, %v823_v55  ;;  %v1189_v59 = vpop.permute.xlu0 %1188 }
 0x1db   :  { %2020 = vmatmul.mubr.msk.f32.vlgmr.msra.gmra.mrb[14].mxu1 %vm852_vm2, %v824_v57  ;;  %v826_v63 = vmax.f32 %v812_v58, 0.0 }
 0x1dc   :  { %v825_v61 = vmax.f32 %v811_v60, 0.0  ;;  %v1990_v62 = vpop.f32.mrb[18].mxu0 }
 0x1dd   :  { %v814_v2 = vadd.f32 %v1990_v62, %v1745_v50  ;;  %v753_v3 = vpop.f32.mrb[19].mxu0 }
 0x1de   :  { %v813_v4 = vadd.f32 %v1745_v50, %v753_v3  ;;  %2022 = vmatprep.mubr.msk.f32.mxu1 %vm852_vm2, %v825_v61 }
 0x1df   :  { %2023 = vmatmul.mubr.msk.f32.gmra.mrb[16].mxu1 %vm852_vm2, %v826_v63  ;;  %v828_v7 = vmax.f32 %v814_v2, 0.0 }
 0x1e0   :  { %v827_v5 = vmax.f32 %v813_v4, 0.0  ;;  %v1993_v6 = vpop.f32.mrb[20].mxu0 }
 0x1e1   :  { %v816_v8 = vadd.f32 %v1993_v6, %v1745_v50  ;;  %v763_v9 = vpop.f32.mrb[21].mxu0 }
 0x1e2   :  { %v815_v10 = vadd.f32 %v1745_v50, %v763_v9  ;;  %2025 = vmatprep.mubr.msk.f32.mxu1 %vm852_vm2, %v827_v5 }
 0x1e3   :  { %2026 = vmatmul.mubr.msk.f32.gmra.mrb[18].mxu1 %vm852_vm2, %v828_v7  ;;  %v830_v13 = vmax.f32 %v816_v8, 0.0  ;;  %v1204_v7 = vpop.permute.xlu1 %1203 }
 0x1e4   :  { %v829_v11 = vmax.f32 %v815_v10, 0.0  ;;  %v1996_v12 = vpop.f32.mrb[22].mxu0  ;;  %v1199_v10 = vpop.permute.xlu0 %1198 }
 0x1e5   :  { %v818_v14 = vadd.f32 %v1996_v12, %v1745_v50  ;;  %v773_v15 = vpop.f32.mrb[23].mxu0 }
 0x1e6   :  { %v817_v16 = vadd.f32 %v1745_v50, %v773_v15  ;;  %2028 = vmatprep.mubr.msk.f32.mxu1 %vm852_vm2, %v829_v11 }
 0x1e7   :  { %2029 = vmatmul.mubr.msk.f32.gmra.mrb[20].mxu1 %vm852_vm2, %v830_v13  ;;  %v832_v19 = vmax.f32 %v818_v14, 0.0 }
 0x1e8   :  { %v831_v17 = vmax.f32 %v817_v16, 0.0  ;;  %v1999_v18 = vpop.f32.mrb[24].mxu0 }
 0x1e9   :  { %v820_v20 = vadd.f32 %v1999_v18, %v1745_v50  ;;  %v783_v21 = vpop.f32.mrb[25].mxu0 }
 0x1ea   :  { %v819_v22 = vadd.f32 %v1745_v50, %v783_v21  ;;  %2031 = vmatprep.mubr.msk.f32.mxu1 %vm852_vm2, %v831_v17 }
 0x1eb   :  { %2032 = vmatmul.mubr.msk.f32.gmra.mrb[22].mxu1 %vm852_vm2, %v832_v19  ;;  %v834_v25 = vmax.f32 %v820_v20, 0.0 }
 0x1ec   :  { %v833_v23 = vmax.f32 %v819_v22, 0.0  ;;  %v2002_v24 = vpop.f32.mrb[26].mxu0  ;;  %v1214_v22 = vpop.permute.xlu1 %1213 }
 0x1ed   :  { %v822_v26 = vadd.f32 %v2002_v24, %v1745_v50  ;;  %v793_v27 = vpop.f32.mrb[27].mxu0 }
 0x1ee   :  { %v821_v28 = vadd.f32 %v1745_v50, %v793_v27  ;;  %2034 = vmatprep.mubr.msk.f32.mxu1 %vm852_vm2, %v833_v23 }
 0x1ef   :  { %2035 = vmatmul.mubr.msk.f32.gmra.mrb[24].mxu1 %vm852_vm2, %v834_v25  ;;  %v836_v30 = vmax.f32 %v822_v26, 0.0  ;;  %v1209_v25 = vpop.permute.xlu0 %1208 }
 0x1f0   :  { %v835_v29 = vmax.f32 %v821_v28, 0.0 }
 0x1f2   :  { %2037 = vmatprep.mubr.msk.f32.mxu1 %vm852_vm2, %v835_v29  ;;  %v1310_v29 = vld [vmem:[%s2842_s3] sm:$0xff] }
 0x1f3   :  { %2038 = vmatmul.mubr.msk.f32.gmra.mrb[26].mxu1 %vm852_vm2, %v836_v30 }
 0x1f4   :  { %2068 = vmatprep.mubr.msk.f32.mxu1 %vm1312_vm3, %v1310_v29 }
 0x2ae   :  { %v2021_v36 = vpop.f32.mrb[14].mxu1 }
 0x2af   :  { %v2640_v37 = vadd.f32 %v2021_v36, %v2637_v34  ;;  %v961_v38 = vpop.f32.mrb[15].mxu1 }
 0x2b0   :  { %v2643_v39 = vadd.f32 %v2637_v34, %v961_v38  ;;  %v1224_v38 = vpop.permute.xlu1 %1223 }
 0x2b1   :  { %v1031_v40 = vmax.f32 %v2640_v37, 0.0 }
 0x2b2   :  { %v1030_v42 = vmax.f32 %v2643_v39, 0.0  ;;  %v2024_v43 = vpop.f32.mrb[16].mxu1 }
 0x2b3   :  { %v1227_v45 = vmul.f32 %v1164_v35, %v1031_v40  ;;  %v2650_v46 = vadd.f32 %v2024_v43, %v2637_v34  ;;  %v971_v47 = vpop.f32.mrb[17].mxu1  ;;  %v1219_v43 = vpop.permute.xlu0 %1218 }
 0x2b4   :  { %v1226_v48 = vmul.f32 %v1159_v32, %v1030_v42  ;;  %v2655_v49 = vadd.f32 %v2637_v34, %v971_v47 }
 0x2b5   :  { %v1033_v50 = vmax.f32 %v2650_v46, 0.0  ;;  %1256 = vrot.lane.b32.xlu1 %v1227_v45, %s2244_s10 }
 0x2b6   :  { %v1032_v51 = vmax.f32 %v2655_v49, 0.0  ;;  %1254 = vrot.lane.b32.xlu0 %v1226_v48, %s2244_s10  ;;  %v2027_v52 = vpop.f32.mrb[18].mxu1 }
 0x2b7   :  { %v1229_v53 = vmul.f32 %v1174_v33, %v1033_v50  ;;  %v2664_v54 = vadd.f32 %v2027_v52, %v2637_v34  ;;  %v981_v55 = vpop.f32.mrb[19].mxu1  ;;  %v1061_v47 = vpop.permute.xlu0 %1060 }
 0x2b8   :  { %v1228_v57 = vmul.f32 %v1169_v31, %v1032_v51  ;;  %v2669_v58 = vadd.f32 %v2637_v34, %v981_v55 }
 0x2b9   :  { %v1035_v60 = vmax.f32 %v2664_v54, 0.0  ;;  %1260 = vrot.lane.b32.xlu1 %v1229_v53, %s2244_s10 }
 0x2ba   :  { %v1034_v61 = vmax.f32 %v2669_v58, 0.0  ;;  %1258 = vrot.lane.b32.xlu0 %v1228_v57, %s2244_s10  ;;  %v2030_v62 = vpop.f32.mrb[20].mxu1 }
 0x2bb   :  { %v1231_v63 = vmul.f32 %v1184_v41, %v1035_v60  ;;  %v2678_v2 = vadd.f32 %v2030_v62, %v2637_v34  ;;  %v991_v3 = vpop.f32.mrb[21].mxu1  ;;  %v1071_v52 = vpop.permute.xlu0 %1070 }
 0x2bc   :  { %v1230_v4 = vmul.f32 %v1179_v44, %v1034_v61  ;;  %v2683_v5 = vadd.f32 %v2637_v34, %v991_v3 }
 0x2bd   :  { %v1037_v6 = vmax.f32 %v2678_v2, 0.0  ;;  %1264 = vrot.lane.b32.xlu1 %v1231_v63, %s2244_s10 }
 0x2be   :  { %v1036_v8 = vmax.f32 %v2683_v5, 0.0  ;;  %1262 = vrot.lane.b32.xlu0 %v1230_v4, %s2244_s10  ;;  %v2033_v9 = vpop.f32.mrb[22].mxu1 }
 0x2bf   :  { %v1233_v11 = vmul.f32 %v1194_v56, %v1037_v6  ;;  %v2692_v12 = vadd.f32 %v2033_v9, %v2637_v34  ;;  %v1001_v13 = vpop.f32.mrb[23].mxu1  ;;  %v1081_v55 = vpop.permute.xlu0 %1080 }
 0x2c0   :  { %v1232_v14 = vmul.f32 %v1189_v59, %v1036_v8  ;;  %v2697_v15 = vadd.f32 %v2637_v34, %v1001_v13 }
 0x2c1   :  { %v1039_v16 = vmax.f32 %v2692_v12, 0.0  ;;  %1268 = vrot.lane.b32.xlu1 %v1233_v11, %s2244_s10  ;;  %v1128_v11 = vmul.f32 %v1061_v47, %v1030_v42  ;;  %v1132_v42 = vmul.f32 %v1081_v55, %v1034_v61 }
 0x2c2   :  { %v1038_v17 = vmax.f32 %v2697_v15, 0.0  ;;  %1266 = vrot.lane.b32.xlu0 %v1232_v14, %s2244_s10  ;;  %v2036_v18 = vpop.f32.mrb[24].mxu1 }
 0x2c3   :  { %v1235_v19 = vmul.f32 %v1204_v7, %v1039_v16  ;;  %v2706_v20 = vadd.f32 %v2036_v18, %v2637_v34  ;;  %v1011_v21 = vpop.f32.mrb[25].mxu1  ;;  %v1091_v57 = vpop.permute.xlu0 %1090 }
 0x2c4   :  { %v1234_v23 = vmul.f32 %v1199_v10, %v1038_v17  ;;  %v2711_v24 = vadd.f32 %v2637_v34, %v1011_v21 }
 0x2c5   :  { %v1041_v26 = vmax.f32 %v2706_v20, 0.0  ;;  %1272 = vrot.lane.b32.xlu1 %v1235_v19, %s2244_s10 }
 0x2c6   :  { %v1040_v27 = vmax.f32 %v2711_v24, 0.0  ;;  %1270 = vrot.lane.b32.xlu0 %v1234_v23, %s2244_s10  ;;  %v2039_v28 = vpop.f32.mrb[26].mxu1  ;;  %v1130_v23 = vmul.f32 %v1071_v52, %v1032_v51  ;;  %v1398_v24 = vld [vmem:[%s2851_s12] sm:$0xff] }
 0x2c7   :  { %v1237_v30 = vmul.f32 %v1214_v22, %v1041_v26  ;;  %v2723_v31 = vadd.f32 %v2039_v28, %v2637_v34  ;;  %v1021_v32 = vpop.f32.mrb[27].mxu1  ;;  %v1101_v62 = vpop.permute.xlu0 %1100 }
 0x2c8   :  { %v1236_v33 = vmul.f32 %v1209_v25, %v1040_v27  ;;  %v2729_v35 = vadd.f32 %v2637_v34, %v1021_v32  ;;  %v1066_v34 = vpop.permute.xlu1 %1065 }
 0x2c9   :  { %v1043_v36 = vmax.f32 %v2723_v31, 0.0  ;;  %1276 = vrot.lane.b32.xlu1 %v1237_v30, %s2244_s10  ;;  %v1129_v9 = vmul.f32 %v1066_v34, %v1031_v40 }
 0x2ca   :  { %v1042_v41 = vmax.f32 %v2729_v35, 0.0  ;;  %1274 = vrot.lane.b32.xlu0 %v1236_v33, %s2244_s10  ;;  %v1134_v33 = vmul.f32 %v1091_v57, %v1036_v8  ;;  %v1400_v35 = vld [vmem:[%s2851_s12 + $0x10] sm:$0xff] }
 0x2cb   :  { %v1239_v44 = vmul.f32 %v1224_v38, %v1043_v36  ;;  %v1111_v3 = vpop.permute.xlu0 %1110 }
 0x2cc   :  { %v1238_v45 = vmul.f32 %v1219_v43, %v1042_v41  ;;  %v1076_v48 = vpop.permute.xlu1 %1075  ;;  %v1138_v47 = vmul.f32 %v1111_v3, %v1040_v27  ;;  %v1399_v27 = vld [vmem:[%s2851_s12 + $0x8] sm:$0xff]  ;;  %v1396_v3 = vld [vmem:[%s2850_s11 + $0x10] sm:$0xff] }
 0x2cd   :  { %1280 = vrot.lane.b32.xlu1 %v1239_v44, %s2244_s10  ;;  %v1131_v19 = vmul.f32 %v1076_v48, %v1033_v50  ;;  %v1136_v44 = vmul.f32 %v1101_v62, %v1038_v17  ;;  %v1395_v62 = vld [vmem:[%s2850_s11 + $0x8] sm:$0xff] }
 0x2ce   :  { %1278 = vrot.lane.b32.xlu0 %v1238_v45, %s2244_s10 }
 0x2cf   :  { %v1121_v7 = vpop.permute.xlu0 %1120 }
 0x2d0   :  { %v1086_v53 = vpop.permute.xlu1 %1085 }
 0x2d1   :  { %v1133_v37 = vmul.f32 %v1086_v53, %v1035_v60  ;;  %v1140_v53 = vmul.f32 %v1121_v7, %v1042_v41  ;;  %v1401_v41 = vld [vmem:[%s2851_s12 + $0x18] sm:$0xff] }
 0x2d2   :  { %v2176_v57 = vpack.c.bf16 %v1401_v41, %v1400_v35 }
 0x2d4   :  { %v1096_v56 = vpop.permute.xlu1 %1095 }
 0x2d5   :  { %v1135_v49 = vmul.f32 %v1096_v56, %v1037_v6  ;;  %v1311_v56 = vld [vmem:[%s2842_s3 + $0x8] sm:$0xff] }
 0x2d8   :  { %v1106_v59 = vpop.permute.xlu1 %1105 }
 0x2d9   :  { %v1137_v58 = vmul.f32 %v1106_v59, %v1039_v16  ;;  %v1394_v59 = vld [vmem:[%s2850_s11] sm:$0xff] }
 0x2dc   :  { %v1116_v63 = vpop.permute.xlu1 %1115 }
 0x2dd   :  { %v1139_v5 = vmul.f32 %v1116_v63, %v1041_v26  ;;  %v2180_v63 = vpack.c.bf16 %v1395_v62, %v1394_v59 }
 0x2e0   :  { %v1126_v4 = vpop.permute.xlu1 %1125 }
 0x2e1   :  { %v1141_v15 = vmul.f32 %v1126_v4, %v1043_v36  ;;  %v2172_v36 = vpack.c.bf16 %v1399_v27, %v1398_v24  ;;  %v1397_v4 = vld [vmem:[%s2850_s11 + $0x18] sm:$0xff] }
 0x327   :  { %v1257_v10 = vpop.permute.xlu1 %1256 }
 0x328   :  { %v1297_v13 = vadd.f32 %v1257_v10, %v1129_v9  ;;  %v1255_v14 = vpop.permute.xlu0 %1254  ;;  %v2184_v10 = vpack.c.bf16 %v1397_v4, %v1396_v3 }
 0x329   :  { %v1296_v18 = vadd.f32 %v1255_v14, %v1128_v11  ;;  %v1575_v11 = vld [vmem:[%s2853_s14] sm:$0xff] }
 0x32b   :  { %v2144_v21 = vpack.c.bf16 %v1297_v13, %v1296_v18  ;;  %v1261_v22 = vpop.permute.xlu1 %1260  ;;  %v1576_v13 = vld [vmem:[%s2853_s14 + $0x8] sm:$0xff]  ;;  %v1577_v18 = vld [vmem:[%s2853_s14 + $0x10] sm:$0xff] }
 0x32c   :  { %v1299_v25 = vadd.f32 %v1261_v22, %v1131_v19  ;;  %v1259_v28 = vpop.permute.xlu0 %1258  ;;  %v2188_v14 = vpack.c.bf16 %v1576_v13, %v1575_v11  ;;  %v1578_v19 = vld [vmem:[%s2853_s14 + $0x18] sm:$0xff]  ;;  %v1767_v22 = vld [vmem:[%s2852_s13] ss:$0 sm:$0xff]  ;;  %s2245_s14 = smov [#allocation2]  }
 0x32d   :  { %v1298_v29 = vadd.f32 %v1259_v28, %v1130_v23  ;;  %2145 = vmatprep.subr.bf16.mxu1 %v2144_v21  ;;  %s1678_s13 = sshll.u32 %s2245_s14, 4  ;;  %s1679_s13 = int_to_ptr.vmem [resolvable:$true] %s1678_s13 }
 0x32e   :  { %2147 = vmatpush3.bf16.msra.mxu1 %v2144_v21  ;;  %v2192_v21 = vpack.c.bf16 %v1578_v19, %v1577_v18  ;;  %s2219_s17 = scalar_lea.vmem %s1679_s13, 256  ;;  %p2224_p1 = scmp.lt.s32.totalorder %s1679_s13, %s1679_s13 }
 0x32f   :  { %v2148_v39 = vpack.c.bf16 %v1299_v25, %v1298_v29  ;;  %v1265_v40 = vpop.permute.xlu1 %1264  ;;  %p2220_p0 = scmp.ne.s32.totalorder %s1679_s13, %s2219_s17  ;;  %p2225_p2 = scmp.lt.s32.totalorder %s2219_s17, %s2219_s17 }
 0x330   :  { %v1301_v46 = vadd.f32 %v1265_v40, %v1133_v37  ;;  %v1263_v50 = vpop.permute.xlu0 %1262  ;;  %v1768_v40 = vld [vmem:[%s2854_s15] ss:$0 sm:$0xff] }
 0x331   :  { %v1300_v30 = vadd.f32 %v1263_v50, %v1132_v42  ;;  %2149 = vmatprep.subr.bf16.mxu1 %v2148_v39  ;;  %p2226_p3 = por %p2225_p2, %p2224_p1 }
 0x332   :  { %2151 = vmatpush3.bf16.msra.mxu1 %v2148_v39 }
 0x333   :  { %v2152_v51 = vpack.c.bf16 %v1301_v46, %v1300_v30  ;;  %v1269_v32 = vpop.permute.xlu1 %1268  ;;  %p2227_p4 = pnand %p2226_p3, %p2220_p0 }
 0x334   :  { %v1303_v54 = vadd.f32 %v1269_v32, %v1135_v49  ;;  %v1267_v60 = vpop.permute.xlu0 %1266 }
 0x335   :  { %v1302_v38 = vadd.f32 %v1267_v60, %v1134_v33  ;;  %2153 = vmatprep.subr.bf16.mxu1 %v2152_v51 }
 0x336   :  { %2155 = vmatpush3.bf16.msra.mxu1 %v2152_v51 }
 0x337   :  { %v2156_v61 = vpack.c.bf16 %v1303_v54, %v1302_v38  ;;  %v1273_v43 = vpop.permute.xlu1 %1272 }
 0x338   :  { %v1305_v2 = vadd.f32 %v1273_v43, %v1137_v58  ;;  %v1271_v6 = vpop.permute.xlu0 %1270 }
 0x339   :  { %v1304_v45 = vadd.f32 %v1271_v6, %v1136_v44  ;;  %2157 = vmatprep.subr.bf16.mxu1 %v2156_v61 }
 0x33a   :  { %2159 = vmatpush3.bf16.msra.mxu1 %v2156_v61 }
 0x33b   :  { %v2160_v8 = vpack.c.bf16 %v1305_v2, %v1304_v45  ;;  %v1277_v34 = vpop.permute.xlu1 %1276 }
 0x33c   :  { %v1307_v12 = vadd.f32 %v1277_v34, %v1139_v5  ;;  %v1275_v16 = vpop.permute.xlu0 %1274 }
 0x33d   :  { %v1306_v48 = vadd.f32 %v1275_v16, %v1138_v47  ;;  %2161 = vmatprep.subr.bf16.mxu1 %v2160_v8 }
 0x33e   :  { %2163 = vmatpush3.bf16.msra.mxu1 %v2160_v8 }
 0x33f   :  { %v2164_v17 = vpack.c.bf16 %v1307_v12, %v1306_v48  ;;  %v1281_v52 = vpop.permute.xlu1 %1280 }
 0x340   :  { %v1309_v20 = vadd.f32 %v1281_v52, %v1141_v15  ;;  %v1279_v26 = vpop.permute.xlu0 %1278 }
 0x341   :  { %v1308_v55 = vadd.f32 %v1279_v26, %v1140_v53  ;;  %2165 = vmatprep.subr.bf16.mxu1 %v2164_v17 }
 0x342   :  { %2167 = vmatpush3.bf16.msra.mxu1 %v2164_v17 }
 0x343   :  { %v2168_v31 = vpack.c.bf16 %v1309_v20, %v1308_v55 }
 0x345   :  { %2169 = vmatprep.subr.bf16.mxu1 %v2168_v31 }
 0x346   :  { %2171 = vmatpush3.bf16.msra.mxu1 %v2168_v31 }
 0x347   :  { %2173 = vmatprep.subr.bf16.mxu1 %v2172_v36 }
 0x349   :  { %2069 = vmatmul.mubr.msk.f32.vlgmr.msra.gmra.mrb[28].mxu1 %vm1312_vm3, %v1311_v56 }
 0x34a   :  { %2175 = vmatpush3.bf16.msra.mxu1 %v2172_v36 }
 0x34b   :  { %2177 = vmatprep.subr.bf16.mxu1 %v2176_v57 }
 0x34e   :  { %2179 = vmatpush3.bf16.msra.mxu1 %v2176_v57 }
 0x34f   :  { %2181 = vmatprep.subr.bf16.mxu1 %v2180_v63 }
 0x41c   :  { %v2070_v7 = vpop.f32.mrb[28].mxu1 }
 0x41d   :  { %v1385_v9 = vpop.f32.mrb[29].mxu1 }
 0x41e   :  { %2079 = vmatprep.mubr.msk.f32.mxu1 %vm447_vm1, %v1385_v9 }
 0x41f   :  { %2080 = vmatmul.mubr.msk.f32.vlgmr.msra.gmra.mrb[30].mxu1 %vm447_vm1, %v2070_v7 }
 0x420   :  { %2183 = vmatpush3.bf16.msra.mxu1 %v2180_v63  ;;  %2090 = vmatprep.mubr.msk.f32.mxu1 %vm447_vm1, %v2336_v0 }
 0x421   :  { %2185 = vmatprep.subr.bf16.mxu1 %v2184_v10 }
 0x424   :  { %2187 = vmatpush3.bf16.msra.mxu1 %v2184_v10 }
 0x425   :  { %2189 = vmatprep.subr.bf16.mxu1 %v2188_v14 }
 0x427   :  { %2091 = vmatmul.mubr.msk.f32.vlgmr.msra.gmra.mrb[30].mxu1 %vm447_vm1, %v2341_v1 }
 0x428   :  { %2191 = vmatpush3.bf16.msra.mxu1 %v2188_v14 }
 0x429   :  { %2193 = vmatprep.subr.bf16.mxu1 %v2192_v21 }
 0x42c   :  { %2195 = vmatpush3.bf16.msra.mxu1 %v2192_v21 }
 0x4fa   :  { %v2092_v23 = vpop.f32.mrb[30].mxu1 }
 0x4fb   :  { %v1572_v25 = vadd.f32 %v2092_v23, %v1767_v22  ;;  %v1555_v28 = vpop.f32.mrb[31].mxu1 }
 0x4fc   :  { %v1571_v29 = vadd.f32 %v1767_v22, %v1555_v28 }
 0x4fd   :  { %v1574_v39 = vmax.f32 %v1572_v25, 0.0 }
 0x4fe   :  { %v1573_v37 = vmax.f32 %v1571_v29, 0.0 }
 0x500   :  { %2101 = vmatprep.mubr.msk.f32.mxu1 %vm447_vm1, %v1573_v37 }
 0x501   :  { %2102 = vmatmul.mubr.msk.f32.vlgmr.msra.gmra.mrb[32].mxu1 %vm447_vm1, %v1574_v39 }
 0x5d4   :  { %v2103_v42 = vpop.f32.mrb[32].mxu1 }
 0x5d5   :  { %v1664_v46 = vadd.f32 %v2103_v42, %v1768_v40  ;;  %v1658_v50 = vpop.f32.mrb[33].mxu1 }
 0x5d6   :  { %v1659_v30 = vadd.f32 %v1768_v40, %v1658_v50 }
 0x5d7   :  { %v1668_v49 = vmax.f32 %v1664_v46, 0.0 }
 0x5d8   :  { %v1667_v51 = vmax.f32 %v1659_v30, 0.0 }
 0x5d9   :  { %v1670_v32 = vadd.f32 %v1668_v49, %v2341_v1 }
 0x5da   :  { %v1669_v33 = vadd.f32 %v1667_v51, %v2336_v0 }
 0x5db   :  { %1672 = vst.msk [vmem:[#allocation2 + $0x8] sm:$0xff] %vm447_vm1, %v1670_v32 }
 0x5dc   :  { %1671 = vst.msk [vmem:[#allocation2] sm:$0xff] %vm447_vm1, %v1669_v33 }
 0x5dd   :  { %2230 = shalt.err (!%p2227_p4)
}
 0x5de   :  { %s2231_s18 = scalar_lea.hbm %s2855_s16, 256 }
 0x5df   :  { %p2232_p5 = scmp.ne.s32.totalorder %s2855_s16, %s2231_s18  ;;  %p2235_p6 = scmp.lt.u32.totalorder %s2231_s18, %s2855_s16 }
 0x5e1   :  { %p2237_p7 = pnand %p2235_p6, %p2232_p5 }
 0x5e3   :  { %2240 = shalt.err (!%p2237_p7)
}
 0x5e4   :  { %s2246_s22 = smov 128   ;;  %s2247_s23 = smov 8  }
 0x5e5   :  { %1684 = dma.vmem_to_hbm [thread:$0]  %s1679_s13, 256, %s2855_s16, [#allocation3], %s2246_s22, %s2246_s22, %s2247_s23  }
 0x5e6   :  { %2241 = dma.done.wait [#allocation3], 256  }
 0x5e7   :  { %2242 = vsyncadd [#allocation3], 4294967040 }
 0x5e8   :  { %1688 = vsyncpa [#allocation3], 1 }

</bundles_post_ra>
